<compile_context>
chip_gen: v7x
topology: tpu7x:2x2x1
jax: 0.10.0
libtpu: 0.0.40
codegen_flags: <defaults>
</compile_context>

<pallas_src>
import jax
import jax.numpy as jnp
from jax.experimental import pallas as pl
from jax.experimental.pallas import tpu as pltpu

IN_FEATURES = 2
OUT_FEATURES = 1

LANE = 128      # TPU lane width (last dim of every block)
SUBLANE = 8     # f32 sublane tile
TR_MAX = 2048   # rows per grid step: x-slab = 2*TR*128*4 B = 2 MiB (4096 on v7x is also fine)


def _svm_kernel(p_ref, x_ref, o_ref):
    # p_ref: (3,)           f32 SMEM = [w0, w1, b]
    # x_ref: (2, TR, 128)   f32 VMEM  (feature-major; batch dense on sublane+lane)
    # o_ref: (TR, 128)      VMEM      (fully dense output -> unmasked vst)
    w0 = p_ref[0]
    w1 = p_ref[1]
    b = p_ref[2]
    # Single expression: 2 FMAs per sample on the VPU, scalars broadcast once.
    o_ref[...] = (w0 * x_ref[0] + w1 * x_ref[1] + b).astype(o_ref.dtype)


def svm_forward_feature_major(x_fm, weight, bias, *, out_dtype=jnp.float32):
    """Core kernel call on the dense feature-major layout (no relayout pass).

    x_fm:   (2, R, 128) float32 with R a multiple of 8; sample s lives at
            x_fm[:, s // 128, s % 128].
    Returns (R, 128) `out_dtype` with y for sample s at [s // 128, s % 128].
    """
    feat, r, lane = x_fm.shape
    assert feat == IN_FEATURES and lane == LANE and r % SUBLANE == 0

    tr = min(TR_MAX, r)
    num_tiles = pl.cdiv(r, tr)

    params = jnp.concatenate(
        [weight.astype(jnp.float32).reshape(-1),
         bias.astype(jnp.float32).reshape(-1)]
    )  # (3,) = [w0, w1, b]

    n_samples = r * LANE
    cost = pl.CostEstimate(
        flops=4 * n_samples,            # 2 mul + 2 add per sample
        transcendentals=0,
        bytes_accessed=(x_fm.size * 4
                        + n_samples * jnp.dtype(out_dtype).itemsize
                        + 3 * 4),       # purely memory-bound
    )

    return pl.pallas_call(
        _svm_kernel,
        out_shape=jax.ShapeDtypeStruct((r, LANE), out_dtype),
        grid_spec=pltpu.PrefetchScalarGridSpec(
            num_scalar_prefetch=0,
            grid=(num_tiles,),
            in_specs=[
                # whole (3,) param vector resident in SMEM
                pl.BlockSpec(memory_space=pltpu.MemorySpace.SMEM),
                # (2, TR, 128) activation slab: sublane- and lane-dense
                pl.BlockSpec((IN_FEATURES, tr, LANE), lambda i: (0, i, 0)),
            ],
            out_specs=pl.BlockSpec((tr, LANE), lambda i: (i, 0)),
        ),
        compiler_params=pltpu.CompilerParams(
            # batch tiles are independent -> megacore sharding on v7x
            dimension_semantics=("parallel",),
        ),
        cost_estimate=cost,
    )(params, x_fm)


def svm_forward(x, weight, bias, *, out_dtype=jnp.float32):
    """PyTorch-interface wrapper: y = x @ weight.T + bias.

    x: (N, 2), weight: (1, 2), bias: (1,)  ->  y: (N, 1)
    """
    n = x.shape[0]
    if n == 0:
        # empty batch: avoid a degenerate zero-size grid
        return jnp.zeros((0, OUT_FEATURES), out_dtype)

    r = pl.cdiv(n, LANE)                              # rows of 128 samples
    r = ((r + SUBLANE - 1) // SUBLANE) * SUBLANE      # sublane-dense
    tr = min(TR_MAX, r)
    r_pad = ((r + tr - 1) // tr) * tr                 # whole number of grid steps
    n_pad = r_pad * LANE

    # One-time relayout (a full HBM read+write pass for large N).  Producers
    # that can emit the (2, R, 128) feature-major layout should call
    # svm_forward_feature_major directly and skip this pass entirely.
    x_fm = jnp.zeros((IN_FEATURES, n_pad), jnp.float32)
    x_fm = x_fm.at[:, :n].set(x.astype(jnp.float32).T)
    x_fm = x_fm.reshape(IN_FEATURES, r_pad, LANE)

    out = svm_forward_feature_major(x_fm, weight, bias, out_dtype=out_dtype)

    # Padded tail positions hold `b`; slice them off before any downstream use.
    return out.reshape(-1)[:n].reshape(n, OUT_FEATURES)


if __name__ == "__main__":
    key = jax.random.PRNGKey(0)
    kx, kw, kb = jax.random.split(key, 3)

    # deterministic params (PyTorch Linear default: U(-1/sqrt(in), 1/sqrt(in)))
    bound = 1.0 / (IN_FEATURES ** 0.5)
    weight = jax.random.uniform(
        kw, (OUT_FEATURES, IN_FEATURES), jnp.float32, -bound, bound
    )
    bias = jax.random.uniform(kb, (OUT_FEATURES,), jnp.float32, -bound, bound)

    # small batch of 2-D points, as the SVM forward implies
    x = jax.random.normal(kx, (8, IN_FEATURES), jnp.float32)

    y = svm_forward(x, weight, bias)
    y = jax.block_until_ready(y)

    # correctness check against plain JAX reference
    y_ref = x @ weight.T + bias
    assert y.shape == (8, OUT_FEATURES)
    assert jnp.allclose(y, y_ref, atol=1e-5, rtol=1e-5), (y, y_ref)

    print("KERNEL_OK")
</pallas_src>

<mosaic_0001>
module attributes {stable_mosaic.version = 11 : i64} {
  func.func @_svm_kernel(%arg0: i32, %arg1: memref<3xf32, #tpu.memory_space<smem>>, %arg2: memref<2x8x128xf32, #tpu.memory_space<vmem>>, %arg3: memref<8x128xf32, #tpu.memory_space<vmem>>) attributes {dimension_semantics = [#tpu.dimension_semantics<parallel>], iteration_bounds = array<i64: 1>, scalar_prefetch = 0 : i64, scratch_operands = 0 : i64, tpu.core_type = #tpu.core_type<tc>, window_params = [{transform_indices = @transform_0, window_bounds = array<i64: 3>}, {transform_indices = @transform_1, window_bounds = array<i64: 2, 8, 128>}, {transform_indices = @transform_2, window_bounds = array<i64: 8, 128>}]} {
    %c0 = arith.constant 0 : index
    %0 = memref.load %arg1[%c0] : memref<3xf32, #tpu.memory_space<smem>>
    %c1 = arith.constant 1 : index
    %1 = memref.load %arg1[%c1] : memref<3xf32, #tpu.memory_space<smem>>
    %c2 = arith.constant 2 : index
    %2 = memref.load %arg1[%c2] : memref<3xf32, #tpu.memory_space<smem>>
    %c0_0 = arith.constant 0 : index
    %c0_1 = arith.constant 0 : index
    %c0_2 = arith.constant 0 : index
    %3 = vector.load %arg2[%c0_0, %c0_1, %c0_2] : memref<2x8x128xf32, #tpu.memory_space<vmem>>, vector<1x8x128xf32>
    %4 = vector.shape_cast %3 : vector<1x8x128xf32> to vector<8x128xf32>
    %5 = vector.broadcast %0 : f32 to vector<8x128xf32>
    %6 = arith.mulf %5, %4 : vector<8x128xf32>
    %c1_3 = arith.constant 1 : index
    %c0_4 = arith.constant 0 : index
    %c0_5 = arith.constant 0 : index
    %7 = vector.load %arg2[%c1_3, %c0_4, %c0_5] : memref<2x8x128xf32, #tpu.memory_space<vmem>>, vector<1x8x128xf32>
    %8 = vector.shape_cast %7 : vector<1x8x128xf32> to vector<8x128xf32>
    %9 = vector.broadcast %1 : f32 to vector<8x128xf32>
    %10 = arith.mulf %9, %8 : vector<8x128xf32>
    %11 = arith.addf %6, %10 : vector<8x128xf32>
    %12 = vector.broadcast %2 : f32 to vector<8x128xf32>
    %13 = arith.addf %11, %12 : vector<8x128xf32>
    %c0_6 = arith.constant 0 : index
    %c0_7 = arith.constant 0 : index
    %14 = vector.load %arg3[%c0_6, %c0_7] : memref<8x128xf32, #tpu.memory_space<vmem>>, vector<8x128xf32>
    tpu.vector_store %arg3[%c0_6, %c0_7], %13 {strides = array<i32>} : memref<8x128xf32, #tpu.memory_space<vmem>>, vector<8x128xf32>,
    return
  }
  func.func @transform_0(%arg0: i32) -> i32 {
    %c0_i32 = arith.constant 0 : i32
    %c0_i32_0 = arith.constant 0 : i32
    return %c0_i32 : i32
  }
  func.func @transform_1(%arg0: i32) -> (i32, i32, i32) {
    %c0_i32 = arith.constant 0 : i32
    %c0_i32_0 = arith.constant 0 : i32
    %c0_i32_1 = arith.constant 0 : i32
    return %c0_i32, %arg0, %c0_i32_0 : i32, i32, i32
  }
  func.func @transform_2(%arg0: i32) -> (i32, i32) {
    %c0_i32 = arith.constant 0 : i32
    %c0_i32_0 = arith.constant 0 : i32
    return %arg0, %c0_i32 : i32, i32
  }
}

</mosaic_0001>

<bundles_post_ra>
// kernel: tpu_custom_call.1
= control target key start
LH: loop header
LB: loop body
LE: loop exit
PB: predicated region body
PF: predicated region fallthrough
CT: control target
= control target key end

     0   :  { %7 = vsyncpa [#allocation5], 0  ;;  %s190_s0 = inlined_call_operand.hbm [shape: f32[3], index: 0, kind: input, shape index: {}]   ;;  %s191_s1 = inlined_call_operand.hbm [shape: f32[2,8,128], index: 1, kind: input, shape index: {}]   ;;  %s192_s2 = inlined_call_operand.hbm [shape: f32[8,128], index: 2, kind: output, shape index: {}]  }
   0x1   :  { %8 = vsyncpa [#allocation3], 0 }
   0x2   :  { %9 = vsyncpa [#allocation4], 0  ;;  %s74_s11 = scalar_lea.hbm %s190_s0, 16 }
   0x3   :  { %p75_p0 = scmp.ne.s32.totalorder %s190_s0, %s74_s11  ;;  %p78_p1 = scmp.lt.u32.totalorder %s74_s11, %s190_s0 }
   0x5   :  { %p80_p2 = pnand %p78_p1, %p75_p0 }
   0x7   :  { %83 = shalt.err (!%p80_p2)
}
   0x8   :  { %s134_s16 = smov [#allocation2]   ;;  %s135_s19 = smov [#allocation6]  }
   0x9   :  { %17 = dma.hbm_to_smem %s190_s0, 16, %s134_s16, [#allocation5]  }
   0xa   :  { %s23_s20 = sshll.u32 %s135_s19, 4  ;;  %s84_s23 = scalar_lea.hbm %s191_s1, 256  ;;  %s24_s20 = int_to_ptr.vmem [resolvable:$true] %s23_s20 }
   0xb   :  { %p85_p3 = scmp.ne.s32.totalorder %s191_s1, %s84_s23  ;;  %p88_p4 = scmp.lt.u32.totalorder %s84_s23, %s191_s1 }
   0xd   :  { %p90_p5 = pnand %p88_p4, %p85_p3 }
   0xf   :  { %93 = shalt.err (!%p90_p5)
}
  0x10   :  { %s94_s28 = scalar_lea.vmem %s24_s20, 256  ;;  %p99_p7 = scmp.lt.s32.totalorder %s24_s20, %s24_s20 }
  0x11   :  { %p95_p6 = scmp.ne.s32.totalorder %s24_s20, %s94_s28  ;;  %p100_p8 = scmp.lt.s32.totalorder %s94_s28, %s94_s28 }
  0x13   :  { %p101_p9 = por %p100_p8, %p99_p7 }
  0x15   :  { %p102_p10 = pnand %p101_p9, %p95_p6 }
  0x17   :  { %105 = shalt.err (!%p102_p10)
}
  0x18   :  { %s136_s0 = smov 128   ;;  %s137_s29 = smov 8  }
  0x19   :  { %29 = dma.hbm_to_vmem [thread:$0]  %s191_s1, 256, %s24_s20, [#allocation3], %s136_s0, %s136_s0, %s137_s29  }
  0x1a   :  { %128 = dma.done.wait [#allocation5], 16  }
  0x1b   :  { %129 = vsyncadd [#allocation5], 4294967280 }
  0x1c   :  { %130 = dma.done.wait [#allocation3], 256  }
  0x1d   :  { %131 = vsyncadd [#allocation3], 4294967040 }
  0x1e   :  { %36 = sfence }
  0x1f   :  { %s37_s4 = sld [smem:[#allocation2]]  ;;  %s67_s5 = sld [smem:[#allocation2 + $0x1]]  ;;  %v40_v0 = vld [vmem:[#allocation6] sm:$0xff]  ;;  %v44_v1 = vld [vmem:[#allocation6 + $0x8] sm:$0xff] }
  0x20   :  { %s68_s6 = sld [smem:[#allocation2 + $0x2]]  ;;  %s138_s7 = smov [#allocation7]  }
  0x21   :  { %s57_s8 = sshll.u32 %s138_s7, 4  ;;  %s58_s8 = int_to_ptr.vmem [resolvable:$true] %s57_s8 }
  0x22   :  { %s106_s1 = scalar_lea.vmem %s58_s8, 128  ;;  %p111_p12 = scmp.lt.s32.totalorder %s58_s8, %s58_s8 }
  0x23   :  { %p107_p11 = scmp.ne.s32.totalorder %s58_s8, %s106_s1  ;;  %p112_p13 = scmp.lt.s32.totalorder %s106_s1, %s106_s1 }
  0x25   :  { %v41_v2 = vstv %s37_s4  ;;  %v45_v3 = vstv %s67_s5  ;;  %p113_p0 = por %p112_p13, %p111_p12 }
  0x26   :  { %v42_v4 = vmul.f32 %v41_v2, %v40_v0  ;;  %v46_v5 = vmul.f32 %v45_v3, %v44_v1  ;;  %v48_v6 = vstv %s68_s6 }
  0x27   :  { %p114_p1 = pnand %p113_p0, %p107_p11 }
  0x28   :  { %v47_v7 = vadd.f32 %v46_v5, %v42_v4 }
  0x2a   :  { %v49_v8 = vadd.f32 %v48_v6, %v47_v7 }
  0x2c   :  { %50 = vst [vmem:[#allocation7] sm:$0xff] %v49_v8 }
  0x2d   :  { %117 = shalt.err (!%p114_p1)
}
  0x2e   :  { %s118_s11 = scalar_lea.hbm %s192_s2, 128 }
  0x2f   :  { %p119_p2 = scmp.ne.s32.totalorder %s192_s2, %s118_s11  ;;  %p122_p3 = scmp.lt.u32.totalorder %s118_s11, %s192_s2 }
  0x31   :  { %p124_p4 = pnand %p122_p3, %p119_p2 }
  0x33   :  { %127 = shalt.err (!%p124_p4)
}
  0x34   :  { %60 = dma.vmem_to_hbm [thread:$0]  %s58_s8, 128, %s192_s2, [#allocation4]  }
  0x35   :  { %132 = dma.done.wait [#allocation4], 128  }
  0x36   :  { %133 = vsyncadd [#allocation4], 4294967168 }
  0x37   :  { %64 = vsyncpa [#allocation3], 1 }
  0x38   :  { %65 = vsyncpa [#allocation4], 1 }
  0x39   :  { %66 = vsyncpa [#allocation5], 1 }

</bundles_post_ra>
